<compile_context>
chip_gen: v7x
topology: tpu7x:2x2x1
jax: 0.10.0
libtpu: 0.0.40
codegen_flags: <defaults>
</compile_context>

<pallas_src>
from functools import partial

import jax
import jax.numpy as jnp
from jax import lax
from jax.experimental import pallas as pl
from jax.experimental.pallas import tpu as pltpu

LANE = 128           # lane width == padded label axis (one full MXU N tile)
ONES_COL = LANE - 1  # column of the augmented weight that holds the all-ones vector


def _fused_kernel(thr_ref, x_ref, w_ref, cs_ref, b_ref, out_ref,
                  acc_raw, acc_s2, *, n_samples):
    k = pl.program_id(0)
    nk = pl.num_programs(0)

    @pl.when(k == 0)
    def _init():
        acc_raw[...] = jnp.zeros_like(acc_raw)
        acc_s2[...] = jnp.zeros_like(acc_s2)

    # ---- streaming K step: single pass over this (B, tk) audio tile ---------
    x = x_ref[...].astype(jnp.float32)                        # (B, tk)
    # MXU: raw x @ [w | 1]; the ones column folds the row-sum s1 into the matmul
    acc_raw[...] += jnp.dot(x.astype(jnp.bfloat16), w_ref[...],
                            preferred_element_type=jnp.float32)
    # VPU mul + lane reduce: sum(x^2) partial, f32 accumulate
    acc_s2[...] += jnp.sum(x * x, axis=1, keepdims=True)

    # ---- epilogue: normalization fold, argmax, mode, threshold --------------
    @pl.when(k == nk - 1)
    def _finalize():
        raw = acc_raw[...]                                    # (B, Lp) f32
        B, Lp = raw.shape
        col = lax.broadcasted_iota(jnp.int32, (B, Lp), 1)
        inv_s = jnp.float32(1.0 / n_samples)

        # row-sum s1 came out of the MXU as the ones column of `raw`
        s1 = jnp.sum(jnp.where(col == ONES_COL, raw, 0.0),
                     axis=1, keepdims=True)                   # (B, 1)
        mean = s1 * inv_s                                     # E[x]
        msq = acc_s2[...] * inv_s                             # E[x^2]

        # rms_value = sqrt(mean(x**2, dim=1)).mean()
        rms = jnp.mean(jnp.sqrt(msq), axis=0, keepdims=True)  # (1, 1)

        # per-sample normalization folded into the linear head:
        #   logits = rsqrt(var+eps) * (x @ w - mean * colsum(w)) + bias
        var = jnp.maximum(msq - mean * mean, 0.0)
        inv_std = lax.rsqrt(var + 1e-7)                       # (B, 1)
        logits = inv_std * (raw - mean * cs_ref[...]) + b_ref[...]   # (B, Lp)

        # argmax(dim=-1), first-occurrence tie-break (torch.argmax semantics);
        # padded/ones columns carry bias -1e30 so they can never win.
        mx = jnp.max(logits, axis=-1, keepdims=True)
        labels = jnp.min(jnp.where(logits >= mx, col, Lp),
                         axis=-1, keepdims=True)              # (B, 1) int32

        # torch.mode over the batch: smallest most-frequent label
        counts = jnp.sum((labels == col).astype(jnp.int32),
                         axis=0, keepdims=True)               # (1, Lp)
        lab = lax.broadcasted_iota(jnp.int32, (1, Lp), 1)
        cmax = jnp.max(counts, axis=-1, keepdims=True)
        mode = jnp.min(jnp.where(counts >= cmax, lab, Lp),
                       axis=-1, keepdims=True)                # (1, 1) int32

        # threshold branch in-band: -1 if rms < threshold
        thr = thr_ref[0, 0]
        result = jnp.where(rms >= thr, mode, jnp.int32(-1))
        out_ref[...] = jnp.broadcast_to(result, out_ref.shape)  # lane-dense store


def prepare_inference_params(w, b, threshold=0.1):
    """One-time host-side parameter prep (hoisted out of the per-call jit).

    Returns (w_aug, colsum_w, b_pad, thr):
      w_aug    (S, 128) bf16 : [classifier weight | zeros | ones column]
      colsum_w (1, 128) f32  : column sums of w_aug (for the normalization fold)
      b_pad    (1, 128) f32  : bias; padded entries -1e30 so they never win
      thr      (1, 1)   f32  : rms threshold scalar (lives in SMEM)
    """
    S, L = w.shape
    assert L < LANE, "label axis must leave room for the ones column"
    w_aug = jnp.zeros((S, LANE), jnp.bfloat16)
    w_aug = w_aug.at[:, :L].set(w.astype(jnp.bfloat16))
    w_aug = w_aug.at[:, ONES_COL].set(jnp.ones((S,), jnp.bfloat16))
    colsum_w = jnp.sum(w_aug.astype(jnp.float32), axis=0, keepdims=True)
    b_pad = jnp.full((1, LANE), -1e30, jnp.float32)
    b_pad = b_pad.at[:, :L].set(b.reshape(1, L).astype(jnp.float32))
    thr = jnp.full((1, 1), threshold, jnp.float32)
    return w_aug, colsum_w, b_pad, thr


def _choose_tk(S, max_tk=4096):
    # largest multiple of 128 that divides S and is <= max_tk (v7x-safe tile:
    # double-buffered (B,tk) f32 + (tk,128) bf16 stays well under the 32 MiB
    # scoped-VMEM default while already saturating HBM BW).
    best = None
    t = 128
    while t <= min(S, max_tk):
        if S % t == 0:
            best = t
        t += 128
    if best is None:
        raise ValueError("num_samples must be a multiple of 128")
    return best


def batched_inference_with_threshold(audio_batch, w_aug, colsum_w, b_pad, thr,
                                     *, tk=None):
    """Returns scalar int32: -1 if rms < threshold, else mode of argmax labels."""
    B, S = audio_batch.shape
    Lp = w_aug.shape[1]
    assert w_aug.shape[0] == S
    if tk is None:
        tk = _choose_tk(S)
    assert S % tk == 0
    nk = S // tk

    itemsize = jnp.dtype(audio_batch.dtype).itemsize
    cost = pl.CostEstimate(
        flops=2 * B * S * Lp + 3 * B * S,
        transcendentals=2 * B,
        bytes_accessed=B * S * itemsize + S * Lp * 2 + 2 * Lp * 4 + LANE * 4 + 4,
    )

    out = pl.pallas_call(
        partial(_fused_kernel, n_samples=S),
        out_shape=jax.ShapeDtypeStruct((1, LANE), jnp.int32),
        grid=(nk,),
        in_specs=[
            pl.BlockSpec(memory_space=pltpu.SMEM),              # threshold (1,1)
            pl.BlockSpec((B, tk), lambda k: (0, k)),            # audio K tile
            pl.BlockSpec((tk, Lp), lambda k: (k, 0)),           # [w | 1] K tile (bf16)
            pl.BlockSpec((1, Lp), lambda k: (0, 0)),            # colsum(w)
            pl.BlockSpec((1, Lp), lambda k: (0, 0)),            # bias (padded -1e30)
        ],
        out_specs=pl.BlockSpec((1, LANE), lambda k: (0, 0)),
        scratch_shapes=[
            pltpu.VMEM((B, Lp), jnp.float32),                   # raw x@[w|1] accumulator
            pltpu.VMEM((B, 1), jnp.float32),                    # sum(x^2) accumulator
        ],
        compiler_params=pltpu.CompilerParams(
            dimension_semantics=("arbitrary",)),                # K axis = reduction
        cost_estimate=cost,
    )(thr, audio_batch, w_aug, colsum_w, b_pad)

    return out[0, 0]   # -1 if rms < threshold, else mode of predicted labels


if __name__ == "__main__":
    B, S, L = 8, 512, 16          # batch, num_samples, num_labels
    key = jax.random.PRNGKey(0)
    kx, kw, kb = jax.random.split(key, 3)

    # deterministic synthetic inputs (stand-in for the pretrained classifier head)
    audio = jax.random.normal(kx, (B, S), dtype=jnp.float32)      # rms ~ 1.0 > 0.1
    w = jax.random.normal(kw, (S, L), dtype=jnp.float32) * 0.05
    b = jax.random.normal(kb, (1, L), dtype=jnp.float32) * 0.01

    # one-time weight prep (hoisted out of the per-call path)
    params = prepare_inference_params(w, b, threshold=0.1)

    # tk=128 -> 4 grid steps: exercises the streaming accumulate + epilogue path
    fn = jax.jit(partial(batched_inference_with_threshold, tk=128))

    out = jax.block_until_ready(fn(audio, *params))

    # also exercise the below-threshold path (rms ~ 1e-3 < 0.1 -> -1)
    quiet = audio * 1e-3
    out_quiet = jax.block_until_ready(fn(quiet, *params))

    assert int(out_quiet) == -1
    assert 0 <= int(out) < L

    print("KERNEL_OK")
</pallas_src>

<mosaic_0001>
module attributes {stable_mosaic.version = 11 : i64} {
  func.func @_fused_kernel(%arg0: i32, %arg1: memref<1x1xf32, #tpu.memory_space<smem>>, %arg2: memref<8x128xf32, #tpu.memory_space<vmem>>, %arg3: memref<128x128xbf16, #tpu.memory_space<vmem>>, %arg4: memref<1x128xf32, #tpu.memory_space<vmem>>, %arg5: memref<1x128xf32, #tpu.memory_space<vmem>>, %arg6: memref<1x128xi32, #tpu.memory_space<vmem>>, %arg7: memref<8x128xf32, #tpu.memory_space<vmem>>, %arg8: memref<8x1xf32, #tpu.memory_space<vmem>>) attributes {dimension_semantics = [#tpu.dimension_semantics<arbitrary>], iteration_bounds = array<i64: 4>, scalar_prefetch = 0 : i64, scratch_operands = 2 : i64, tpu.core_type = #tpu.core_type<tc>, window_params = [{transform_indices = @transform_0, window_bounds = array<i64: 1, 1>}, {transform_indices = @transform_1, window_bounds = array<i64: 8, 128>}, {transform_indices = @transform_2, window_bounds = array<i64: 128, 128>}, {pipeline_mode = #tpu.pipeline_mode<synchronous>, transform_indices = @transform_3, window_bounds = array<i64: 1, 128>}, {pipeline_mode = #tpu.pipeline_mode<synchronous>, transform_indices = @transform_4, window_bounds = array<i64: 1, 128>}, {pipeline_mode = #tpu.pipeline_mode<synchronous>, transform_indices = @transform_5, window_bounds = array<i64: 1, 128>}]} {
    %c0_i32 = arith.constant 0 : i32
    %0 = arith.cmpi eq, %arg0, %c0_i32 : i32
    %1 = arith.extui %0 : i1 to i32
    %c0_i32_0 = arith.constant 0 : i32
    %2 = arith.cmpi ne, %1, %c0_i32_0 : i32
    scf.if %2 {
      %cst_14 = arith.constant 0.000000e+00 : f32
      %19 = vector.broadcast %cst_14 : f32 to vector<8x128xf32>
      %c0_15 = arith.constant 0 : index
      %c0_16 = arith.constant 0 : index
      %20 = vector.load %arg7[%c0_15, %c0_16] : memref<8x128xf32, #tpu.memory_space<vmem>>, vector<8x128xf32>
      tpu.vector_store %arg7[%c0_15, %c0_16], %19 {strides = array<i32>} : memref<8x128xf32, #tpu.memory_space<vmem>>, vector<8x128xf32>,
      %cst_17 = arith.constant 0.000000e+00 : f32
      %21 = vector.broadcast %cst_17 : f32 to vector<8x1xf32>
      %c0_18 = arith.constant 0 : index
      %c0_19 = arith.constant 0 : index
      %22 = vector.load %arg8[%c0_18, %c0_19] : memref<8x1xf32, #tpu.memory_space<vmem>>, vector<8x1xf32>
      tpu.vector_store %arg8[%c0_18, %c0_19], %21 {strides = array<i32>} : memref<8x1xf32, #tpu.memory_space<vmem>>, vector<8x1xf32>,
    } else {
    }
    %c0 = arith.constant 0 : index
    %c0_1 = arith.constant 0 : index
    %3 = vector.load %arg2[%c0, %c0_1] : memref<8x128xf32, #tpu.memory_space<vmem>>, vector<8x128xf32>
    %c0_2 = arith.constant 0 : index
    %c0_3 = arith.constant 0 : index
    %4 = vector.load %arg7[%c0_2, %c0_3] : memref<8x128xf32, #tpu.memory_space<vmem>>, vector<8x128xf32>
    %5 = arith.truncf %3 : vector<8x128xf32> to vector<8x128xbf16>
    %c0_4 = arith.constant 0 : index
    %c0_5 = arith.constant 0 : index
    %6 = vector.load %arg3[%c0_4, %c0_5] : memref<128x128xbf16, #tpu.memory_space<vmem>>, vector<128x128xbf16>
    %cst = arith.constant dense<0.000000e+00> : vector<8x128xf32>
    %7 = tpu.matmul %5, %6, %cst {dimension_numbers = #tpu.dot_dimension_numbers<[1], [0], [0], [1], [0, 0, 1, 1], [], []>} : vector<8x128xbf16>, vector<128x128xbf16>, vector<8x128xf32> -> vector<8x128xf32>
    %8 = arith.addf %4, %7 : vector<8x128xf32>
    %c0_6 = arith.constant 0 : index
    %c0_7 = arith.constant 0 : index
    %9 = vector.load %arg7[%c0_6, %c0_7] : memref<8x128xf32, #tpu.memory_space<vmem>>, vector<8x128xf32>
    tpu.vector_store %arg7[%c0_6, %c0_7], %8 {strides = array<i32>} : memref<8x128xf32, #tpu.memory_space<vmem>>, vector<8x128xf32>,
    %c0_8 = arith.constant 0 : index
    %c0_9 = arith.constant 0 : index
    %10 = vector.load %arg8[%c0_8, %c0_9] : memref<8x1xf32, #tpu.memory_space<vmem>>, vector<8x1xf32>
    %11 = arith.mulf %3, %3 : vector<8x128xf32>
    %cst_10 = arith.constant dense<0.000000e+00> : vector<8xf32>
    %12 = vector.multi_reduction <add>, %11, %cst_10 [1] : vector<8x128xf32> to vector<8xf32>
    %13 = vector.shape_cast %12 : vector<8xf32> to vector<8x1xf32>
    %14 = arith.addf %10, %13 : vector<8x1xf32>
    %c0_11 = arith.constant 0 : index
    %c0_12 = arith.constant 0 : index
    %15 = vector.load %arg8[%c0_11, %c0_12] : memref<8x1xf32, #tpu.memory_space<vmem>>, vector<8x1xf32>
    tpu.vector_store %arg8[%c0_11, %c0_12], %14 {strides = array<i32>} : memref<8x1xf32, #tpu.memory_space<vmem>>, vector<8x1xf32>,
    %c3_i32 = arith.constant 3 : i32
    %16 = arith.cmpi eq, %arg0, %c3_i32 : i32
    %17 = arith.extui %16 : i1 to i32
    %c0_i32_13 = arith.constant 0 : i32
    %18 = arith.cmpi ne, %17, %c0_i32_13 : i32
    scf.if %18 {
      %c0_14 = arith.constant 0 : index
      %c0_15 = arith.constant 0 : index
      %19 = vector.load %arg7[%c0_14, %c0_15] : memref<8x128xf32, #tpu.memory_space<vmem>>, vector<8x128xf32>
      %20 = tpu.iota {dimensions = array<i32: 1>} : vector<8x128xi32>
      %c127_i32 = arith.constant 127 : i32
      %21 = vector.broadcast %c127_i32 : i32 to vector<8x128xi32>
      %22 = arith.cmpi eq, %20, %21 : vector<8x128xi32>
      %cst_16 = arith.constant 0.000000e+00 : f32
      %23 = vector.broadcast %cst_16 : f32 to vector<8x128xf32>
      %24 = arith.select %22, %19, %23 : vector<8x128xi1>, vector<8x128xf32>
      %cst_17 = arith.constant dense<0.000000e+00> : vector<8xf32>
      %25 = vector.multi_reduction <add>, %24, %cst_17 [1] : vector<8x128xf32> to vector<8xf32>
      %26 = vector.shape_cast %25 : vector<8xf32> to vector<8x1xf32>
      %cst_18 = arith.constant 0.001953125 : f32
      %27 = vector.broadcast %cst_18 : f32 to vector<8x1xf32>
      %28 = arith.mulf %26, %27 : vector<8x1xf32>
      %c0_19 = arith.constant 0 : index
      %c0_20 = arith.constant 0 : index
      %29 = vector.load %arg8[%c0_19, %c0_20] : memref<8x1xf32, #tpu.memory_space<vmem>>, vector<8x1xf32>
      %cst_21 = arith.constant 0.001953125 : f32
      %30 = vector.broadcast %cst_21 : f32 to vector<8x1xf32>
      %31 = arith.mulf %29, %30 : vector<8x1xf32>
      %32 = math.sqrt %31 : vector<8x1xf32>
      %cst_22 = arith.constant dense<0.000000e+00> : vector<1xf32>
      %33 = vector.multi_reduction <add>, %32, %cst_22 [0] : vector<8x1xf32> to vector<1xf32>
      %34 = vector.shape_cast %33 : vector<1xf32> to vector<1x1xf32>
      %cst_23 = arith.constant 8.000000e+00 : f32
      %35 = vector.broadcast %cst_23 : f32 to vector<1x1xf32>
      %36 = arith.divf %34, %35 : vector<1x1xf32>
      %37 = arith.mulf %28, %28 : vector<8x1xf32>
      %38 = arith.subf %31, %37 : vector<8x1xf32>
      %cst_24 = arith.constant 0.000000e+00 : f32
      %39 = vector.broadcast %cst_24 : f32 to vector<8x1xf32>
      %40 = arith.maximumf %38, %39 : vector<8x1xf32>
      %cst_25 = arith.constant 1.000000e-07 : f32
      %41 = vector.broadcast %cst_25 : f32 to vector<8x1xf32>
      %42 = arith.addf %40, %41 : vector<8x1xf32>
      %43 = math.rsqrt %42 : vector<8x1xf32>
      %c0_26 = arith.constant 0 : index
      %c0_27 = arith.constant 0 : index
      %44 = vector.load %arg4[%c0_26, %c0_27] : memref<1x128xf32, #tpu.memory_space<vmem>>, vector<1x128xf32>
      %45 = vector.broadcast %28 : vector<8x1xf32> to vector<8x128xf32>
      %46 = vector.broadcast %44 : vector<1x128xf32> to vector<8x128xf32>
      %47 = arith.mulf %45, %46 : vector<8x128xf32>
      %48 = arith.subf %19, %47 : vector<8x128xf32>
      %49 = vector.broadcast %43 : vector<8x1xf32> to vector<8x128xf32>
      %50 = arith.mulf %49, %48 : vector<8x128xf32>
      %c0_28 = arith.constant 0 : index
      %c0_29 = arith.constant 0 : index
      %51 = vector.load %arg5[%c0_28, %c0_29] : memref<1x128xf32, #tpu.memory_space<vmem>>, vector<1x128xf32>
      %52 = vector.broadcast %51 : vector<1x128xf32> to vector<8x128xf32>
      %53 = arith.addf %50, %52 : vector<8x128xf32>
      %cst_30 = arith.constant dense<0xFF800000> : vector<8xf32>
      %54 = vector.multi_reduction <maximumf>, %53, %cst_30 [1] : vector<8x128xf32> to vector<8xf32>
      %55 = vector.shape_cast %54 : vector<8xf32> to vector<8x1xf32>
      %56 = vector.broadcast %55 : vector<8x1xf32> to vector<8x128xf32>
      %57 = arith.cmpf oge, %53, %56 : vector<8x128xf32>
      %c128_i32 = arith.constant 128 : i32
      %58 = vector.broadcast %c128_i32 : i32 to vector<8x128xi32>
      %59 = arith.select %57, %20, %58 : vector<8x128xi1>, vector<8x128xi32>
      %cst_31 = arith.constant dense<2147483647> : vector<8xi32>
      %60 = vector.multi_reduction <minsi>, %59, %cst_31 [1] : vector<8x128xi32> to vector<8xi32>
      %61 = vector.shape_cast %60 : vector<8xi32> to vector<8x1xi32>
      %62 = vector.broadcast %61 : vector<8x1xi32> to vector<8x128xi32>
      %63 = arith.cmpi eq, %62, %20 : vector<8x128xi32>
      %64 = arith.extui %63 : vector<8x128xi1> to vector<8x128xi32>
      %cst_32 = arith.constant dense<0> : vector<128xi32>
      %65 = vector.multi_reduction <add>, %64, %cst_32 [0] : vector<8x128xi32> to vector<128xi32>
      %66 = vector.shape_cast %65 : vector<128xi32> to vector<1x128xi32>
      %67 = tpu.iota {dimensions = array<i32: 1>} : vector<1x128xi32>
      %cst_33 = arith.constant dense<-2147483648> : vector<1xi32>
      %68 = vector.multi_reduction <maxsi>, %66, %cst_33 [1] : vector<1x128xi32> to vector<1xi32>
      %69 = vector.shape_cast %68 : vector<1xi32> to vector<1x1xi32>
      %70 = vector.broadcast %69 : vector<1x1xi32> to vector<1x128xi32>
      %71 = arith.cmpi sge, %66, %70 : vector<1x128xi32>
      %c128_i32_34 = arith.constant 128 : i32
      %72 = vector.broadcast %c128_i32_34 : i32 to vector<1x128xi32>
      %73 = arith.select %71, %67, %72 : vector<1x128xi1>, vector<1x128xi32>
      %cst_35 = arith.constant dense<2147483647> : vector<1xi32>
      %74 = vector.multi_reduction <minsi>, %73, %cst_35 [1] : vector<1x128xi32> to vector<1xi32>
      %75 = vector.shape_cast %74 : vector<1xi32> to vector<1x1xi32>
      %c0_36 = arith.constant 0 : index
      %c0_37 = arith.constant 0 : index
      %76 = memref.load %arg1[%c0_36, %c0_37] : memref<1x1xf32, #tpu.memory_space<smem>>
      %77 = vector.broadcast %76 : f32 to vector<1x1xf32>
      %78 = arith.cmpf oge, %36, %77 : vector<1x1xf32>
      %c-1_i32 = arith.constant -1 : i32
      %79 = vector.broadcast %c-1_i32 : i32 to vector<1x1xi32>
      %80 = arith.select %78, %75, %79 : vector<1x1xi1>, vector<1x1xi32>
      %81 = vector.shape_cast %80 : vector<1x1xi32> to vector<1x1xi32>
      %82 = vector.broadcast %81 : vector<1x1xi32> to vector<1x128xi32>
      %c0_38 = arith.constant 0 : index
      %c0_39 = arith.constant 0 : index
      %83 = vector.load %arg6[%c0_38, %c0_39] : memref<1x128xi32, #tpu.memory_space<vmem>>, vector<1x128xi32>
      tpu.vector_store %arg6[%c0_38, %c0_39], %82 {strides = array<i32>} : memref<1x128xi32, #tpu.memory_space<vmem>>, vector<1x128xi32>,
    } else {
    }
    return
  }
  func.func @transform_0(%arg0: i32) -> (i32, i32) {
    %c0_i32 = arith.constant 0 : i32
    %c0_i32_0 = arith.constant 0 : i32
    %c0_i32_1 = arith.constant 0 : i32
    return %c0_i32, %c0_i32_0 : i32, i32
  }
  func.func @transform_1(%arg0: i32) -> (i32, i32) {
    %c0_i32 = arith.constant 0 : i32
    %c0_i32_0 = arith.constant 0 : i32
    return %c0_i32, %arg0 : i32, i32
  }
  func.func @transform_2(%arg0: i32) -> (i32, i32) {
    %c0_i32 = arith.constant 0 : i32
    %c0_i32_0 = arith.constant 0 : i32
    return %arg0, %c0_i32 : i32, i32
  }
  func.func @transform_3(%arg0: i32) -> (i32, i32) {
    %c0_i32 = arith.constant 0 : i32
    %c0_i32_0 = arith.constant 0 : i32
    %c0_i32_1 = arith.constant 0 : i32
    return %c0_i32, %c0_i32_0 : i32, i32
  }
  func.func @transform_4(%arg0: i32) -> (i32, i32) {
    %c0_i32 = arith.constant 0 : i32
    %c0_i32_0 = arith.constant 0 : i32
    %c0_i32_1 = arith.constant 0 : i32
    return %c0_i32, %c0_i32_0 : i32, i32
  }
  func.func @transform_5(%arg0: i32) -> (i32, i32) {
    %c0_i32 = arith.constant 0 : i32
    %c0_i32_0 = arith.constant 0 : i32
    %c0_i32_1 = arith.constant 0 : i32
    return %c0_i32, %c0_i32_0 : i32, i32
  }
}

</mosaic_0001>

<bundles_post_ra>
// kernel: batched_inference_with_threshold.1
= control target key start
LH: loop header
LB: loop body
LE: loop exit
PB: predicated region body
PF: predicated region fallthrough
CT: control target
= control target key end

     0   :  { %s1105_s0 = inlined_call_operand.<no memory space> [shape: f32[1,1], index: 0, kind: input, shape index: {}]   ;;  %s1106_s1 = inlined_call_operand.hbm [shape: f32[8,512], index: 1, kind: input, shape index: {}]   ;;  %s1107_s2 = inlined_call_operand.hbm [shape: bf16[512,128], index: 2, kind: input, shape index: {}]   ;;  %s1108_s3 = inlined_call_operand.vmem [shape: f32[1,128], index: 3, kind: input, shape index: {}]   ;;  %s1109_s4 = inlined_call_operand.vmem [shape: f32[1,128], index: 4, kind: input, shape index: {}]   ;;  %s1110_s5 = inlined_call_operand.hbm [shape: s32[1,128], index: 5, kind: output, shape index: {}]  }
   0x1   :  { %10 = sst [smem:[#allocation4]] %s1105_s0 }
   0x2   :  { %11 = vsyncpa [#allocation6], 0 }
   0x3   :  { %13 = vsyncpa [#allocation6 + $0x1], 0 }
   0x4   :  { %14 = vsyncpa [#allocation9], 0 }
   0x5   :  { %16 = vsyncpa [#allocation9 + $0x1], 0 }
   0x6   :  { %17 = vsyncpa [#allocation7], 0  ;;  %s896_s20 = smov 0   ;;  %s898_s21 = smov 0  }
   0x7   :  { %s900_s22 = smov 0   ;;  %s902_s23 = smov 0  }
   0x8 LB: > { %s915_s0 = sadd.s32 4294967295, %s852_s23   ;;  %s918_s24 = sadd.s32 1, %s852_s23   ;;  %s852_s23 = sphi %s902_s23, %s1121_s23   ;;  %s848_s22 = sphi %s900_s22, %s1120_s22   ;;  %s844_s21 = sphi %s898_s21, %s1119_s21   ;;  %s840_s20 = sphi %s896_s20, %s1118_s20  }
   0x9   : > { %s48_s25 = ssub.s32 %s852_s23, %s918_s24  ;;  %s51_s26 = sadd.s32 1, %s848_s22 }
   0xa   : > { %p49_p0 = scmp.eq.s32.totalorder %s48_s25, 0  ;;  %p58_p1 = scmp.ne.s32.totalorder %s848_s22, %s844_s21 }
   0xb   : > { %p59_p2 = scmp.eq.s32.totalorder %s852_s23, 0  ;;  %p64_p3 = scmp.ne.s32.totalorder %s844_s21, %s840_s20 }
   0xc   : > { %s928_s27 = scalar_select %p49_p0, %s848_s22, %s51_s26  }
   0xd   : > { %p60_p4 = por %p59_p2, %p58_p1  ;;  %p65_p5 = scmp.eq.s32.totalorder %s915_s0, 0 }
   0xe   : > { %p668_p6 = scmp.lt.s32.totalorder %s852_s23, 4  ;;  %s937_s29 = sand.u32 1, %s848_s22  }
   0xf   : > { %p932_p7 = por %p65_p5, %p64_p3  ;;  %s599_s30 = sshll.u32 %s937_s29, 3 }
  0x10   : > { %s600_s6 = sshll.u32 %s852_s23, 7  ;;  %s190_s10 = scalar_lea.vmem [#allocation5], %s599_s30 }
  0x11   : > { %s1112_s28 = scalar_select %p932_p7, 1, 0 }
  0x12   : > { %s944_s9 = scalar_lea.hbm %s1106_s1, %s600_s6  ;;  %s197_s11 = sshll.u32 %s190_s10, 4  ;;  %s946_s11 = int_to_ptr.vmem [resolvable:$true] %s197_s11 }
  0x13   : > { %p948_p8 = pnand %p668_p6, %p60_p4  ;;  %s187_s13 = scalar_lea.sflag [#allocation6], %s937_s29 }
  0x14   : > { %s724_s14 = scalar_lea.hbm %s944_s9, 128  ;;  %s729_s17 = scalar_lea.hbm %s1106_s1, 512 }
  0x15   : > { %p725_p11 = scmp.ne.s32.totalorder %s944_s9, %s724_s14  ;;  %p726_p12 = pneg %p948_p8 }
  0x16   : > { %p730_p1 = scmp.lt.u32.totalorder %s944_s9, %s1106_s1  ;;  %p731_p2 = scmp.lt.u32.totalorder %s729_s17, %s724_s14 }
  0x17   : > { %p727_p13 = pnand %p726_p12, %p725_p11  ;;  %p733_p4 = scmp.lt.u32.totalorder %s724_s14, %s944_s9 }
  0x18   : > { %p732_p3 = por %p731_p2, %p730_p1 }
  0x19   : > { %p728_p0 = pneg %p727_p13 }
  0x1a   : > { %p734_p5 = por %p733_p4, %p732_p3 }
  0x1c   : > { %p735_p6 = pnand %p734_p5, %p728_p0 }
  0x1e   : > { %738 = shalt.err (!%p735_p6)
}
  0x1f   : > { %s739_s20 = scalar_lea.vmem %s946_s11, 128  ;;  %s854_s25 = smov [#allocation5]  }
  0x20   : > { %p740_p11 = scmp.ne.s32.totalorder %s946_s11, %s739_s20  ;;  %s744_s26 = sshll.u32 %s854_s25, 4  ;;  %s745_s26 = int_to_ptr.vmem [resolvable:$false] %s744_s26 }
  0x21   : > { %s746_s30 = scalar_lea.vmem %s745_s26, 256  ;;  %p747_p10 = scmp.lt.s32.totalorder %s946_s11, %s745_s26 }
  0x22   : > { %p742_p13 = pnand %p740_p11, %p726_p12  ;;  %p748_p1 = scmp.lt.s32.totalorder %s746_s30, %s739_s20 }
  0x24   : > { %p743_p9 = pneg %p742_p13  ;;  %p749_p2 = por %p748_p1, %p747_p10 }
  0x26   : > { %p750_p3 = pnand %p749_p2, %p743_p9 }
  0x28   : > { %753 = shalt.err (!%p750_p3)
}
  0x29   : > { %664 = dma.hbm_to_vmem [thread:$0]  (!%p948_p8), %s944_s9, 128, %s946_s11, %s187_s13  }
  0x2a   : > { %p1114_p0 = scmp.lt.s32.totalorder %s852_s23, 5  ;;  %p1115_p4 = scmp.ge.s32.totalorder %s852_s23, 1 }
  0x2b   : > { %s601_s7 = sshll.u32 %s937_s29, 6  ;;  %s623_s8 = sshll.u32 %s852_s23, 10 }
  0x2c   : > { %p984_p5 = pnand %p1115_p4, %p1114_p0  ;;  %s993_s15 = scalar_lea.hbm %s1107_s2, %s623_s8 }
  0x2d   : > { %s208_s16 = scalar_lea.vmem [#allocation8], %s601_s7  ;;  %s205_s9 = scalar_lea.sflag [#allocation9], %s937_s29 }
  0x2e   : > { %s215_s17 = sshll.u32 %s208_s16, 4  ;;  %s754_s11 = scalar_lea.hbm %s993_s15, 1024  ;;  %s995_s17 = int_to_ptr.vmem [resolvable:$true] %s215_s17 }
  0x2f   : > { %p755_p9 = scmp.ne.s32.totalorder %s993_s15, %s754_s11  ;;  %s759_s18 = scalar_lea.hbm %s1107_s2, 4096 }
  0x30   : > { %p760_p11 = scmp.lt.u32.totalorder %s993_s15, %s1107_s2  ;;  %p761_p13 = scmp.lt.u32.totalorder %s759_s18, %s754_s11 }
  0x31   : > { %p757_p10 = pnand %p755_p9, %p726_p12  ;;  %p763_p2 = scmp.lt.u32.totalorder %s754_s11, %s993_s15 }
  0x32   : > { %p762_p1 = por %p761_p13, %p760_p11 }
  0x33   : > { %p758_p6 = pneg %p757_p10 }
  0x34   : > { %p764_p3 = por %p763_p2, %p762_p1 }
  0x36   : > { %p765_p0 = pnand %p764_p3, %p758_p6 }
  0x38   : > { %768 = shalt.err (!%p765_p0)
}
  0x39   : > { %s769_s25 = scalar_lea.vmem %s995_s17, 1024  ;;  %s855_s26 = smov [#allocation8]  }
  0x3a   : > { %p770_p4 = scmp.ne.s32.totalorder %s995_s17, %s769_s25  ;;  %s774_s30 = sshll.u32 %s855_s26, 4  ;;  %s775_s30 = int_to_ptr.vmem [resolvable:$false] %s774_s30 }
  0x3b   : > { %s776_s7 = scalar_lea.vmem %s775_s30, 2048  ;;  %p777_p7 = scmp.lt.s32.totalorder %s995_s17, %s775_s30 }
  0x3c   : > { %p772_p9 = pnand %p770_p4, %p726_p12  ;;  %p778_p11 = scmp.lt.s32.totalorder %s776_s7, %s769_s25 }
  0x3e   : > { %p773_p10 = pneg %p772_p9  ;;  %p779_p13 = por %p778_p11, %p777_p7 }
  0x40   : > { %p780_p1 = pnand %p779_p13, %p773_p10 }
  0x42   : > { %783 = shalt.err (!%p780_p1)
}
  0x43   : > { %s856_s8 = smov 64   ;;  %s857_s10 = smov 4  }
  0x44   : > { %667 = dma.hbm_to_vmem [thread:$0]  (!%p948_p8), %s993_s15, 1024, %s995_s17, %s205_s9, %s856_s8, %s856_s8, %s857_s10  }
  0x45   : > { %227 = sbr.rel (%p984_p5) target bundleno = 1837 (0x72d), region = 40  ;;  %s229_s14 = sand.u32 (!%p984_p5), 1, %s844_s21  }
  0x46   : > { %s605_s16 = sshll.u32 (!%p984_p5), %s229_s14, 3  ;;  %s230_s11 = scalar_lea.sflag (!%p984_p5), [#allocation6], %s229_s14 }
  0x47   : > { %s233_s23 = scalar_lea.vmem (!%p984_p5), [#allocation5], %s605_s16  ;;  %p1117_p7 = scmp.ne.s32.totalorder (!%p984_p5), %s1112_s28, 0 }
  0x4c   : > { %827 = dma.done.wait (%p1117_p7), %s230_s11, 128  }
  0x4d   : > { %829 = vsyncadd (%p1117_p7), %s230_s11, 4294967168  ;;  %s606_s13 = sshll.u32 %s229_s14, 6  ;;  %s239_s18 = scalar_lea.sflag [#allocation9], %s229_s14 }
  0x4e   : > { %s1030_s12 = scalar_lea.vmem [#allocation8], %s606_s13 }
  0x4f   : > { %831 = dma.done.wait (%p1117_p7), %s239_s18, 1024  }
  0x50   : > { %833 = vsyncadd (%p1117_p7), %s239_s18, 4294966272  ;;  %p607_p8 = scmp.ne.s32.totalorder %s915_s0, 0 }
  0x51   : > { %vm276_vm0 = vcmask (!%p607_p8), 7168   ;;  %v858_v0 = vmov (!%p607_p8), 0.0  }
  0x52   : > { %274 = sbr.rel (%p607_p8) target bundleno = 89 (0x59), region = 52  ;;  %275 = vst [vmem:[#allocation2] sm:$0xff] (!%p607_p8), %v858_v0  ;;  %277 = vst.msk [vmem:[#allocation3] sm:$0xff] (!%p607_p8), %vm276_vm0, %v858_v0 }
  0x59 PF: > { %v710_v1 = vld [vmem:[%s1030_s12] sm:$0xff]   ;;  %v859_v2 = vmov 0.0   ;;  %v711_v3 = vld [vmem:[%s1030_s12 + $0x8] sm:$0xff]   ;;  %vm860_vm1 = vmmov 0   ;;  %v712_v4 = vld [vmem:[%s1030_s12 + $0x10] sm:$0xff]   ;;  %vm392_vm2 = vcmask 7168  }
  0x5a   : > { %633 = vmatprep.subr.bf16.mxu0 %v859_v2  ;;  %649 = vmatprep.mubr.msk.bf16.mxu0 %vm860_vm1, %v859_v2  ;;  %v278_v5 = vld [vmem:[%s233_s23] sm:$0xff]  ;;  %v714_v8 = vld [vmem:[%s1030_s12 + $0x20] sm:$0xff]   ;;  %v715_v9 = vld [vmem:[%s1030_s12 + $0x28] sm:$0xff]   ;;  %p616_p12 = scmp.ne.s32.totalorder %s915_s0, 3 }
  0x5b   : > { %634 = vmatpush3.bf16.msra.mxu0 %v710_v1  ;;  %v388_v6 = vmul.f32 %v278_v5, %v278_v5  ;;  %v713_v7 = vld [vmem:[%s1030_s12 + $0x18] sm:$0xff]   ;;  %v716_v10 = vld [vmem:[%s1030_s12 + $0x30] sm:$0xff]   ;;  %v280_v12 = vpack.c.bf16 %v278_v5, %v278_v5  ;;  %v387_v13 = vld [vmem:[#allocation3] sm:$0xff]  ;;  %v399_v22 = vlaneseq (!%p616_p12)  ;;  %v861_v26 = vmov (!%p616_p12), 0   ;;  %s508_s17 = sld [smem:[#allocation4]] (!%p616_p12) }
  0x5c   : > { %635 = vmatprep.subr.bf16.mxu0 %v859_v2  ;;  %v717_v11 = vld [vmem:[%s1030_s12 + $0x38] sm:$0xff]   ;;  %v279_v16 = vld [vmem:[#allocation2] sm:$0xff]  ;;  %718 = vset.pattern.permute.xlu0 (!%p616_p12), %v861_v26 }
  0x5d   : > { %389 = vadd.xlane.f32.xlu0 %v388_v6  ;;  %v1047_v24 = vand.u32 (!%p616_p12), 127, %v399_v22  ;;  %719 = vset.pattern.permute.xlu1 (!%p616_p12), %v861_v26  ;;  %v617_v36 = vld [vmem:[%s1108_s3] ss:$0 sm:$0xff] (!%p616_p12) }
  0x5e   : > { %v618_v40 = vld [vmem:[%s1109_s4] ss:$0 sm:$0xff] (!%p616_p12) }
  0x5f   : > { %636 = vmatpush3.bf16.msra.mxu0 %v711_v3  ;;  %vm401_vm3 = vcmp.eq.s32.totalorder (!%p616_p12), %v1047_v24, 127 }
  0x60   : > { %637 = vmatprep.subr.bf16.mxu0 %v859_v2 }
  0x63   : > { %638 = vmatpush3.bf16.msra.mxu0 %v712_v4 }
  0x64   : > { %639 = vmatprep.subr.bf16.mxu0 %v859_v2 }
  0x67   : > { %640 = vmatpush3.bf16.msra.mxu0 %v713_v7 }
  0x68   : > { %641 = vmatprep.subr.bf16.mxu0 %v859_v2 }
  0x6b   : > { %642 = vmatpush3.bf16.msra.mxu0 %v714_v8 }
  0x6c   : > { %643 = vmatprep.subr.bf16.mxu0 %v859_v2 }
  0x6f   : > { %644 = vmatpush3.bf16.msra.mxu0 %v715_v9 }
  0x70   : > { %645 = vmatprep.subr.bf16.mxu0 %v859_v2 }
  0x73   : > { %646 = vmatpush3.bf16.msra.mxu0 %v716_v10 }
  0x74   : > { %647 = vmatprep.subr.bf16.mxu0 %v859_v2 }
  0x77   : > { %648 = vmatpush3.bf16.msra.mxu0 %v717_v11 }
  0x7a   : > { %650 = vmatmul.mubr.bf16.vlgmr.msra.gmra.mrb[0].mxu0 %v280_v12 }
  0xea   : > { %v390_v14 = vpop.xlane.xlu0 %389 }
  0xeb   : > { %v391_v15 = vadd.f32 %v390_v14, %v387_v13 }
  0xed   : > { %393 = vst.msk [vmem:[#allocation3] sm:$0xff] %vm392_vm2, %v391_v15 }
  0xf4   : > { %v406_v27 = vld [vmem:[#allocation3] sm:$0xff] (!%p616_p12) }
  0xf5   : > { %v1050_v29 = vmul.f32 (!%p616_p12), 0.001953125, %v406_v27 }
  0xf7   : > { %vm410_vm10 = vcmp.eq.f32.partialorder (!%p616_p12), %v1050_v29, inf  ;;  %vm412_vm11 = vcmp.eq.f32.partialorder (!%p616_p12), %v1050_v29, 0.0 }
 0x14a   : > { %397 = sbr.rel (%p616_p12) target bundleno = 1812 (0x714), region = 56 }
 0x14d   : > { %v379_v17 = vpop.f32.mrb[0].mxu0 }
 0x14e   : > { %v385_v18 = vadd.f32 %v379_v17, %v279_v16  ;;  %v651_v19 = vpop.f32.mrb[1].mxu0 }
 0x14f   : > { %v382_v20 = vpop.f32.mrb[2].mxu0  ;;  %v413_v19 = vand.u32 (!%p616_p12), 2147483648, %v1050_v29 }
 0x150   : > { %386 = vst [vmem:[#allocation2] sm:$0xff] %v385_v18  ;;  %v652_v21 = vpop.f32.mrb[3].mxu0 }
 0x157   : > { %v398_v23 = vld [vmem:[#allocation2] sm:$0xff] }
 0x158   : > { %v402_v25 = vsel %vm401_vm3, %v398_v23, 0.0 }
 0x159   : > { %403 = vadd.xlane.f32.xlu0 %v402_v25 }
 0x1e6   : > { %v404_v28 = vpop.xlane.xlu0 %403 }
 0x1e7   : > { %v405_v30 = vmul.f32 0.001953125, %v404_v28 }
 0x1e9   : > { %v424_v31 = vmul.f32 %v405_v30, %v405_v30  ;;  %v436_v37 = vmul.f32 %v617_v36, %v405_v30 }
 0x1eb   : > { %v425_v32 = vsub.f32 %v1050_v29, %v424_v31  ;;  %v437_v38 = vsub.f32 %v398_v23, %v436_v37 }
 0x1ed   : > { %v426_v33 = vmax.f32 %v425_v32, 0.0  ;;  %v509_v32 = vstv %s508_s17 }
 0x1ef   : > { %v427_v34 = vadd.f32 1e-07, %v426_v33 }
 0x1f1   : > { %720 = vrsqrt.f32 %v427_v34 }
 0x1f2   : > { %722 = vrsqrt.f32 %v1050_v29 }
 0x1fb   : > { %v721_v35 = vpop.eup %720 }
 0x1fc   : > { %440 = vperm.xlu0 %718, %v721_v35   ;;  %v723_v17 = vpop.eup %722 }
 0x1fd   : > { %v409_v18 = vmul.f32 %v723_v17, %v1050_v29 }
 0x1ff   : > { %v411_v20 = vsel %vm410_vm10, %v1050_v29, %v409_v18 }
 0x200   : > { %v414_v21 = vsel %vm412_vm11, %v413_v19, %v411_v20 }
 0x201   : > { %v415_v22 = vsel %vm392_vm2, %v414_v21, 0.0 }
 0x202   : > { %v416_v23 = vrot.slane %v415_v22, 4 }
 0x27b   : > { %v441_v39 = vpop.permute.xlu0 %440 }
 0x27c   : > { %v443_v41 = vmul.f32 %v441_v39, %v437_v38 }
 0x27e   : > { %v451_v42 = vadd.f32 %v618_v40, %v443_v41 }
 0x280   : > { %452 = vmax.xlane.f32.xlu1 %v451_v42 }
 0x30d   : > { %v453_v43 = vpop.xlane.xlu1 %452 }
 0x30e   : > { %vm454_vm4 = vcmp.ge.f32.partialorder %v451_v42, %v453_v43 }
 0x30f   : > { %v455_v44 = vsel %vm454_vm4, %v1047_v24, 128 }
 0x310   : > { %v457_v45 = vshra.s32 %v455_v44, 16  ;;  %v456_v47 = vand.u32 65535, %v455_v44 }
 0x312   : > { %v459_v46 = vcvt.s32.f32 %v457_v45  ;;  %v458_v49 = vcvt.s32.f32 %v456_v47 }
 0x314   : > { %460 = vmin.xlane.f32.xlu1 %v459_v46 }
 0x3a1   : > { %v461_v48 = vpop.xlane.xlu1 %460 }
 0x3a2   : > { %vm462_vm5 = vcmp.eq.f32.partialorder %v459_v46, %v461_v48  ;;  %v467_v51 = vcvt.f32.s32 %v461_v48 }
 0x3a3   : > { %v463_v50 = vsel %vm462_vm5, %v458_v49, inf }
 0x3a4   : > { %464 = vmin.xlane.f32.xlu1 %v463_v50  ;;  %v468_v53 = vshll.u32 %v467_v51, 16 }
 0x431   : > { %v465_v52 = vpop.xlane.xlu1 %464 }
 0x432   : > { %v466_v54 = vcvt.f32.s32 %v465_v52 }
 0x434   : > { %v469_v55 = vadd.s32 %v468_v53, %v466_v54 }
 0x436   : > { %vm470_vm6 = vcmp.eq.s32.totalorder %v469_v55, %v1047_v24 }
 0x437   : > { %v471_v56 = vsel %vm470_vm6, 1, %v861_v26 }
 0x438   : > { %v472_v57 = vrot.slane %v471_v56, 4 }
 0x43a   : > { %v473_v58 = vadd.s32 %v472_v57, %v471_v56 }
 0x43c   : > { %v474_v59 = vrot.slane %v473_v58, 2 }
 0x43e   : > { %v475_v60 = vadd.s32 %v474_v59, %v473_v58 }
 0x440   : > { %v476_v61 = vrot.slane %v475_v60, 1 }
 0x442   : > { %v477_v62 = vadd.s32 %v476_v61, %v475_v60 }
 0x444   : > { %v479_v63 = vshra.s32 %v477_v62, 16  ;;  %v478_v1 = vand.u32 65535, %v477_v62 }
 0x446   : > { %v481_v0 = vcvt.s32.f32 %v479_v63  ;;  %v480_v3 = vcvt.s32.f32 %v478_v1 }
 0x448   : > { %482 = vmax.xlane.f32.xlu1 %v481_v0 }
 0x4d5   : > { %v483_v2 = vpop.xlane.xlu1 %482 }
 0x4d6   : > { %vm484_vm7 = vcmp.eq.f32.partialorder %v481_v0, %v483_v2  ;;  %v489_v5 = vcvt.f32.s32 %v483_v2 }
 0x4d7   : > { %v485_v4 = vsel %vm484_vm7, %v480_v3, -inf }
 0x4d8   : > { %486 = vmax.xlane.f32.xlu1 %v485_v4  ;;  %v490_v7 = vshll.u32 %v489_v5, 16 }
 0x565   : > { %v487_v6 = vpop.xlane.xlu1 %486 }
 0x566   : > { %v488_v8 = vcvt.f32.s32 %v487_v6 }
 0x568   : > { %v491_v9 = vadd.s32 %v490_v7, %v488_v8 }
 0x56a   : > { %vm492_vm8 = vcmp.ge.s32.totalorder %v477_v62, %v491_v9 }
 0x56b   : > { %v493_v10 = vsel %vm492_vm8, %v1047_v24, 128  ;;  %v417_v24 = vadd.f32 %v416_v23, %v415_v22 }
 0x56c   : > { %v495_v11 = vshra.s32 %v493_v10, 16  ;;  %v494_v13 = vand.u32 65535, %v493_v10 }
 0x56d   : > { %v418_v25 = vrot.slane %v417_v24, 2 }
 0x56e   : > { %v497_v12 = vcvt.s32.f32 %v495_v11  ;;  %v496_v15 = vcvt.s32.f32 %v494_v13 }
 0x56f   : > { %v419_v26 = vadd.f32 %v418_v25, %v417_v24 }
 0x570   : > { %498 = vmin.xlane.f32.xlu1 %v497_v12 }
 0x571   : > { %v420_v27 = vrot.slane %v419_v26, 1 }
 0x573   : > { %v421_v28 = vadd.f32 %v420_v27, %v419_v26 }
 0x575   : > { %v423_v31 = vmul.f32 0.125, %v421_v28 }
 0x577   : > { %vm510_vm12 = vcmp.ge.f32.partialorder %v423_v31, %v509_v32 }
 0x5fd   : > { %v499_v14 = vpop.xlane.xlu1 %498 }
 0x5fe   : > { %vm500_vm9 = vcmp.eq.f32.partialorder %v497_v12, %v499_v14  ;;  %v505_v30 = vcvt.f32.s32 %v499_v14 }
 0x5ff   : > { %v501_v16 = vsel %vm500_vm9, %v496_v15, inf }
 0x600   : > { %502 = vmin.xlane.f32.xlu1 %v501_v16  ;;  %v506_v34 = vshll.u32 %v505_v30, 16 }
 0x68d   : > { %v503_v33 = vpop.xlane.xlu1 %502 }
 0x68e   : > { %v504_v35 = vcvt.f32.s32 %v503_v33 }
 0x690   : > { %v507_v36 = vadd.s32 %v506_v34, %v504_v35 }
 0x692   : > { %v511_v37 = vsel %vm510_vm12, %v507_v36, 4294967295 }
 0x693   : > { %513 = vperm.xlu1 %719, %v511_v37  }
 0x712   : > { %v514_v29 = vpop.permute.xlu1 %513 }
 0x713   : > { %515 = vst [vmem:[#allocation10] sm:$0x1] %v514_v29 }
 0x714 PF: > { %p669_p5 = scmp.eq.s32.totalorder %s915_s0, 3  ;;  %s862_s9 = smov [#allocation10]  }
 0x715   : > { %s523_s19 = sshll.u32 %s862_s9, 4  ;;  %s524_s19 = int_to_ptr.vmem [resolvable:$true] %s523_s19 }
 0x716   : > { %s784_s20 = scalar_lea.vmem %s524_s19, 16  ;;  %s790_s25 = scalar_lea.vmem %s524_s19, 32 }
 0x717   : > { %p785_p6 = scmp.ne.s32.totalorder %s524_s19, %s784_s20  ;;  %p791_p0 = scmp.lt.s32.totalorder %s524_s19, %s524_s19 }
 0x718   : > { %p792_p4 = scmp.lt.s32.totalorder %s790_s25, %s784_s20 }
 0x719   : > { %p786_p2 = pnand %p785_p6, %p669_p5 }
 0x71a   : > { %p793_p9 = por %p792_p4, %p791_p0 }
 0x71b   : > { %p787_p3 = pneg %p786_p2 }
 0x71d   : > { %p794_p10 = pnand %p793_p9, %p787_p3 }
 0x71f   : > { %797 = shalt.err (!%p794_p10)
}
 0x720   : > { %s798_s7 = scalar_lea.hbm %s1110_s5, 16 }
 0x721   : > { %p799_p11 = scmp.ne.s32.totalorder %s1110_s5, %s798_s7  ;;  %p804_p7 = scmp.lt.u32.totalorder %s798_s7, %s1110_s5 }
 0x723   : > { %p800_p13 = pnand %p799_p11, %p669_p5 }
 0x725   : > { %p801_p1 = pneg %p800_p13 }
 0x727   : > { %p806_p8 = pnand %p804_p7, %p801_p1 }
 0x729   : > { %809 = shalt.err (!%p806_p8)
}
 0x72a   : > { %658 = dma.vmem_to_hbm [thread:$0]  (%p669_p5), %s524_s19, 16, %s1110_s5, [#allocation7]  }
 0x72b   : > { %835 = dma.done.wait (%p669_p5), [#allocation7], 16  }
 0x72c   : > { %837 = vsyncadd (%p669_p5), [#allocation7], 4294967280 }
 0x72d PF: > { %p20_p12 = scmp.ge.s32.totalorder %s918_s24, 6   ;;  %s1118_s20 = smov %s844_s21 }
 0x72e   : > { %s1119_s21 = smov %s848_s22  ;;  %s1120_s22 = smov %s928_s27 }
 0x72f   : > { %s1121_s23 = smov %s918_s24  ;;  %22 = sbr.rel (!%p20_p12) target bundleno = 8 (0x8), region = 98 }
 0x736   :  { %536 = vsyncpa [#allocation6], 1 }
 0x737   :  { %538 = vsyncpa [#allocation6 + $0x1], 1 }
 0x738   :  { %539 = vsyncpa [#allocation9], 1 }
 0x739   :  { %541 = vsyncpa [#allocation9 + $0x1], 1 }
 0x73a   :  { %542 = vsyncpa [#allocation7], 1 }
 0x73b   :  { %544 = vsyncpa [#allocation7 + $0x1], 1 }

</bundles_post_ra>
